<compile_context>
chip_gen: v7x
topology: tpu7x:2x2x1
jax: 0.10.0
libtpu: 0.0.40
codegen_flags: <defaults>
</compile_context>

<pallas_src>
import functools

import jax
import jax.numpy as jnp
from jax import lax
from jax.experimental import pallas as pl
from jax.experimental.pallas import tpu as pltpu


def _moco_loss_kernel(q_ref, k_ref, queue_ref, out_ref,
                      qs_scr, pos_scr, m_scr, s_scr, *,
                      inv_t, assume_normalized):
    j = pl.program_id(1)
    nk = pl.num_programs(1)

    # First queue tile for this batch block: compute pos once, stage the
    # (1/T)-scaled q tile in the matmul operand dtype, reset the LSE state.
    @pl.when(j == 0)
    def _init():
        qf = q_ref[...].astype(jnp.float32)
        kf = k_ref[...].astype(jnp.float32)
        pos_scr[...] = jnp.sum(qf * kf, axis=1, keepdims=True) * inv_t
        qs_scr[...] = (qf * inv_t).astype(qs_scr.dtype)
        s_scr[...] = jnp.zeros_like(s_scr)
        if not assume_normalized:
            m_scr[...] = jnp.full_like(m_scr, -jnp.inf)

    # Negative logits for this queue tile: (TN, TK) on the MXU with f32
    # accumulation, contracting the last (lane) dim of both operands so the
    # queue tile is used exactly as loaded (no transpose / relayout).
    neg = lax.dot_general(
        qs_scr[...],
        queue_ref[...],
        dimension_numbers=(((1,), (1,)), ((), ())),
        preferred_element_type=jnp.float32,
    )

    if assume_normalized:
        # L2-normalized features: |neg| <= 1/T (up to rounding), so a fixed
        # shift is enough -- no per-tile XLU max, no rescale of the sum.
        s_scr[...] = s_scr[...] + jnp.sum(jnp.exp(neg - inv_t),
                                          axis=1, keepdims=True)
    else:
        # Online (streaming) logsumexp update over the K tiles.
        m_prev = m_scr[...]
        m_new = jnp.maximum(m_prev, jnp.max(neg, axis=1, keepdims=True))
        alpha = jnp.exp(m_prev - m_new)
        s_scr[...] = alpha * s_scr[...] + jnp.sum(jnp.exp(neg - m_new),
                                                  axis=1, keepdims=True)
        m_scr[...] = m_new

    # Last queue tile: fold in the positive logit and emit the per-row loss.
    @pl.when(j == nk - 1)
    def _finalize():
        pos = pos_scr[...]
        if assume_normalized:
            m_neg = jnp.full_like(pos, inv_t)
        else:
            m_neg = m_scr[...]
        m = jnp.maximum(m_neg, pos)
        total = jnp.exp(pos - m) + jnp.exp(m_neg - m) * s_scr[...]
        out_ref[...] = m + jnp.log(total) - pos


def _pick_block(dim, candidates):
    for c in candidates:
        if c <= dim and dim % c == 0:
            return c
    return dim


def moco_loss(q, k, queue, *, t=0.07, block_n=None, block_k=None,
              assume_normalized=False):
    """MoCo InfoNCE loss.

    q: (N, D), k: (N, D), queue: (K, D).  Returns scalar f32 loss.

    The queue is streamed in the dtype it is given: keep the MoCo memory bank
    persistently in bf16 for the fast MXU path (halves the dominant HBM
    stream); pass f32 for exact f32 matmul numerics.
    """
    n, d = q.shape
    kq, dq = queue.shape
    assert k.shape == (n, d) and dq == d

    # --- Tile selection -----------------------------------------------------
    # block_n is the arithmetic-intensity knob: HBM queue traffic is
    # (N / block_n) * K * D * itemsize, so prefer the fewest queue passes.
    if block_k is None:
        block_k = _pick_block(kq, (4096, 2048, 1024, 512, 256, 128))
    if block_n is None:
        block_n = _pick_block(n, (1024, 512, 256, 128, 64, 32, 16, 8))
        # v7x megacore: keep >=2 batch blocks so the "parallel" axis can shard
        # across the two TensorCores, but only when each half stays well above
        # the compute-bound threshold (otherwise one queue pass wins).
        if n // block_n == 1 and n % 16 == 0 and (n // 2) >= 256:
            block_n = n // 2
        # Cap the (block_n, block_k) f32 compiler temps (neg + exp(neg-m)) so
        # big tiles stay comfortably inside v7x's 64 MiB VMEM.
        while block_n * block_k > (1 << 21) and block_k > 512:
            block_k //= 2
    assert n % block_n == 0, (n, block_n)
    assert kq % block_k == 0, (kq, block_k)

    grid = (n // block_n, kq // block_k)
    n_queue_passes = grid[0]

    kernel = functools.partial(
        _moco_loss_kernel,
        inv_t=float(1.0 / t),
        assume_normalized=bool(assume_normalized),
    )

    # --- VMEM budget (double-buffered inputs + f32 matmul temps) -------------
    vmem_need = (
        2 * block_n * d * q.dtype.itemsize          # q (double-buffered)
        + 2 * block_n * d * k.dtype.itemsize        # k
        + 2 * block_k * d * queue.dtype.itemsize    # queue
        + 2 * block_n * 4                           # out
        + block_n * d * queue.dtype.itemsize        # scaled-q scratch
        + 3 * block_n * 4                           # pos / m / s scratch
        + 2 * block_n * block_k * 4                 # neg + exp temps
    )
    vmem_limit = int(min(64 << 20, max(32 << 20, int(vmem_need * 1.5))))

    per_row = pl.pallas_call(
        kernel,
        out_shape=jax.ShapeDtypeStruct((n, 1), jnp.float32),
        grid_spec=pltpu.PrefetchScalarGridSpec(
            num_scalar_prefetch=0,
            grid=grid,
            in_specs=[
                pl.BlockSpec((block_n, d), lambda i, j: (i, 0)),   # q
                pl.BlockSpec((block_n, d), lambda i, j: (i, 0)),   # k
                pl.BlockSpec((block_k, d), lambda i, j: (j, 0)),   # queue
            ],
            out_specs=pl.BlockSpec((block_n, 1), lambda i, j: (i, 0)),
            scratch_shapes=[
                pltpu.VMEM((block_n, d), queue.dtype),   # q * (1/T), operand dtype
                pltpu.VMEM((block_n, 1), jnp.float32),   # pos / T
                pltpu.VMEM((block_n, 1), jnp.float32),   # running max
                pltpu.VMEM((block_n, 1), jnp.float32),   # running sum of exp
            ],
        ),
        compiler_params=pltpu.CompilerParams(
            dimension_semantics=("parallel", "arbitrary"),
            vmem_limit_bytes=vmem_limit,
        ),
        cost_estimate=pl.CostEstimate(
            flops=2 * n * kq * d + 2 * n * d,
            transcendentals=n * kq + n * (kq // block_k) + 3 * n,
            # Queue is re-streamed once per batch block.
            bytes_accessed=n_queue_passes * kq * d * queue.dtype.itemsize
            + n * d * (q.dtype.itemsize + k.dtype.itemsize)
            + n * 4,
        ),
    )(q, k, queue)

    return jnp.mean(per_row)


def _reference(q, k, queue, t=0.07):
    # Mirrors the kernel's numerics: pos in f32; neg matmul with the q tile
    # pre-scaled by 1/T and cast to the queue dtype, f32 accumulation.
    inv_t = 1.0 / t
    pos = jnp.sum(q.astype(jnp.float32) * k.astype(jnp.float32),
                  axis=1, keepdims=True) * inv_t
    qs = (q.astype(jnp.float32) * inv_t).astype(queue.dtype)
    neg = jnp.dot(qs, queue.T, preferred_element_type=jnp.float32)
    logits = jnp.concatenate([pos, neg], axis=1)
    lse = jax.scipy.special.logsumexp(logits, axis=1)
    return jnp.mean(lse - logits[:, 0])


if __name__ == "__main__":
    # Small shapes consistent with the module (features are D=128 embeddings).
    N, D, K = 32, 128, 512

    key = jax.random.PRNGKey(0)
    kq_, kk_, km_ = jax.random.split(key, 3)
    q = jax.random.normal(kq_, (N, D), dtype=jnp.float32)
    k = jax.random.normal(kk_, (N, D), dtype=jnp.float32)
    queue = jax.random.normal(km_, (K, D), dtype=jnp.float32)
    # MoCo features are L2-normalized embeddings.
    q = q / jnp.linalg.norm(q, axis=1, keepdims=True)
    k = k / jnp.linalg.norm(k, axis=1, keepdims=True)
    queue = queue / jnp.linalg.norm(queue, axis=1, keepdims=True)
    # Fast path: the MoCo memory bank is kept persistently in bf16.
    queue_bf16 = queue.astype(jnp.bfloat16)

    # 1) Default tiling (single queue pass at these shapes), bf16 queue.
    loss_a = jax.block_until_ready(moco_loss(q, k, queue_bf16))
    ref_a = jax.block_until_ready(_reference(q, k, queue_bf16))
    assert jnp.allclose(loss_a, ref_a, rtol=2e-3, atol=2e-3), (loss_a, ref_a)

    # 2) Forced multi-tile grid (exercises the online-LSE streaming path).
    loss_b = jax.block_until_ready(
        moco_loss(q, k, queue_bf16, block_n=8, block_k=128))
    assert jnp.allclose(loss_b, ref_a, rtol=2e-3, atol=2e-3), (loss_b, ref_a)

    # 3) f32 queue + fixed-shift path for L2-normalized features.
    loss_c = jax.block_until_ready(
        moco_loss(q, k, queue, block_n=8, block_k=128, assume_normalized=True))
    ref_c = jax.block_until_ready(_reference(q, k, queue))
    assert jnp.allclose(loss_c, ref_c, rtol=2e-3, atol=2e-3), (loss_c, ref_c)

    print("KERNEL_OK")
</pallas_src>

<mosaic_0001>
module attributes {stable_mosaic.version = 11 : i64} {
  func.func @_moco_loss_kernel(%arg0: i32, %arg1: i32, %arg2: memref<32x128xf32, #tpu.memory_space<vmem>>, %arg3: memref<32x128xf32, #tpu.memory_space<vmem>>, %arg4: memref<512x128xbf16, #tpu.memory_space<vmem>>, %arg5: memref<32x1xf32, #tpu.memory_space<vmem>>, %arg6: memref<32x128xbf16, #tpu.memory_space<vmem>>, %arg7: memref<32x1xf32, #tpu.memory_space<vmem>>, %arg8: memref<32x1xf32, #tpu.memory_space<vmem>>, %arg9: memref<32x1xf32, #tpu.memory_space<vmem>>) attributes {dimension_semantics = [#tpu.dimension_semantics<parallel>, #tpu.dimension_semantics<arbitrary>], iteration_bounds = array<i64: 1, 1>, scalar_prefetch = 0 : i64, scratch_operands = 4 : i64, tpu.core_type = #tpu.core_type<tc>, window_params = [{transform_indices = @transform_0, window_bounds = array<i64: 32, 128>}, {transform_indices = @transform_1, window_bounds = array<i64: 32, 128>}, {transform_indices = @transform_2, window_bounds = array<i64: 512, 128>}, {transform_indices = @transform_3, window_bounds = array<i64: 32, 1>}]} {
    %c0_i32 = arith.constant 0 : i32
    %0 = arith.cmpi eq, %arg1, %c0_i32 : i32
    %1 = arith.extui %0 : i1 to i32
    %c0_i32_0 = arith.constant 0 : i32
    %2 = arith.cmpi ne, %1, %c0_i32_0 : i32
    scf.if %2 {
      %c0_16 = arith.constant 0 : index
      %c0_17 = arith.constant 0 : index
      %25 = vector.load %arg2[%c0_16, %c0_17] : memref<32x128xf32, #tpu.memory_space<vmem>>, vector<32x128xf32>
      %c0_18 = arith.constant 0 : index
      %c0_19 = arith.constant 0 : index
      %26 = vector.load %arg3[%c0_18, %c0_19] : memref<32x128xf32, #tpu.memory_space<vmem>>, vector<32x128xf32>
      %27 = arith.mulf %25, %26 : vector<32x128xf32>
      %cst_20 = arith.constant dense<0.000000e+00> : vector<32xf32>
      %28 = vector.multi_reduction <add>, %27, %cst_20 [1] : vector<32x128xf32> to vector<32xf32>
      %29 = vector.shape_cast %28 : vector<32xf32> to vector<32x1xf32>
      %cst_21 = arith.constant 14.2857141 : f32
      %30 = vector.broadcast %cst_21 : f32 to vector<32x1xf32>
      %31 = arith.mulf %29, %30 : vector<32x1xf32>
      %c0_22 = arith.constant 0 : index
      %c0_23 = arith.constant 0 : index
      %32 = vector.load %arg7[%c0_22, %c0_23] : memref<32x1xf32, #tpu.memory_space<vmem>>, vector<32x1xf32>
      tpu.vector_store %arg7[%c0_22, %c0_23], %31 {strides = array<i32>} : memref<32x1xf32, #tpu.memory_space<vmem>>, vector<32x1xf32>,
      %cst_24 = arith.constant 14.2857141 : f32
      %33 = vector.broadcast %cst_24 : f32 to vector<32x128xf32>
      %34 = arith.mulf %25, %33 : vector<32x128xf32>
      %35 = arith.truncf %34 : vector<32x128xf32> to vector<32x128xbf16>
      %c0_25 = arith.constant 0 : index
      %c0_26 = arith.constant 0 : index
      %36 = vector.load %arg6[%c0_25, %c0_26] : memref<32x128xbf16, #tpu.memory_space<vmem>>, vector<32x128xbf16>
      tpu.vector_store %arg6[%c0_25, %c0_26], %35 {strides = array<i32>} : memref<32x128xbf16, #tpu.memory_space<vmem>>, vector<32x128xbf16>,
      %cst_27 = arith.constant 0.000000e+00 : f32
      %37 = vector.broadcast %cst_27 : f32 to vector<32x1xf32>
      %c0_28 = arith.constant 0 : index
      %c0_29 = arith.constant 0 : index
      %38 = vector.load %arg9[%c0_28, %c0_29] : memref<32x1xf32, #tpu.memory_space<vmem>>, vector<32x1xf32>
      tpu.vector_store %arg9[%c0_28, %c0_29], %37 {strides = array<i32>} : memref<32x1xf32, #tpu.memory_space<vmem>>, vector<32x1xf32>,
      %cst_30 = arith.constant 0xFF800000 : f32
      %39 = vector.broadcast %cst_30 : f32 to vector<32x1xf32>
      %c0_31 = arith.constant 0 : index
      %c0_32 = arith.constant 0 : index
      %40 = vector.load %arg8[%c0_31, %c0_32] : memref<32x1xf32, #tpu.memory_space<vmem>>, vector<32x1xf32>
      tpu.vector_store %arg8[%c0_31, %c0_32], %39 {strides = array<i32>} : memref<32x1xf32, #tpu.memory_space<vmem>>, vector<32x1xf32>,
    } else {
    }
    %c0 = arith.constant 0 : index
    %c0_1 = arith.constant 0 : index
    %3 = vector.load %arg6[%c0, %c0_1] : memref<32x128xbf16, #tpu.memory_space<vmem>>, vector<32x128xbf16>
    %c0_2 = arith.constant 0 : index
    %c0_3 = arith.constant 0 : index
    %4 = vector.load %arg4[%c0_2, %c0_3] : memref<512x128xbf16, #tpu.memory_space<vmem>>, vector<512x128xbf16>
    %cst = arith.constant dense<0.000000e+00> : vector<32x512xf32>
    %5 = tpu.matmul %3, %4, %cst {dimension_numbers = #tpu.dot_dimension_numbers<[1], [1], [0], [0], [0, 0, 1, 0], [], []>} : vector<32x128xbf16>, vector<512x128xbf16>, vector<32x512xf32> -> vector<32x512xf32>
    %c0_4 = arith.constant 0 : index
    %c0_5 = arith.constant 0 : index
    %6 = vector.load %arg8[%c0_4, %c0_5] : memref<32x1xf32, #tpu.memory_space<vmem>>, vector<32x1xf32>
    %cst_6 = arith.constant dense<0xFF800000> : vector<32xf32>
    %7 = vector.multi_reduction <maximumf>, %5, %cst_6 [1] : vector<32x512xf32> to vector<32xf32>
    %8 = vector.shape_cast %7 : vector<32xf32> to vector<32x1xf32>
    %9 = arith.maximumf %6, %8 : vector<32x1xf32>
    %10 = arith.subf %6, %9 : vector<32x1xf32>
    %11 = math.exp %10 : vector<32x1xf32>
    %c0_7 = arith.constant 0 : index
    %c0_8 = arith.constant 0 : index
    %12 = vector.load %arg9[%c0_7, %c0_8] : memref<32x1xf32, #tpu.memory_space<vmem>>, vector<32x1xf32>
    %13 = arith.mulf %11, %12 : vector<32x1xf32>
    %14 = vector.broadcast %9 : vector<32x1xf32> to vector<32x512xf32>
    %15 = arith.subf %5, %14 : vector<32x512xf32>
    %16 = math.exp %15 : vector<32x512xf32>
    %cst_9 = arith.constant dense<0.000000e+00> : vector<32xf32>
    %17 = vector.multi_reduction <add>, %16, %cst_9 [1] : vector<32x512xf32> to vector<32xf32>
    %18 = vector.shape_cast %17 : vector<32xf32> to vector<32x1xf32>
    %19 = arith.addf %13, %18 : vector<32x1xf32>
    %c0_10 = arith.constant 0 : index
    %c0_11 = arith.constant 0 : index
    %20 = vector.load %arg9[%c0_10, %c0_11] : memref<32x1xf32, #tpu.memory_space<vmem>>, vector<32x1xf32>
    tpu.vector_store %arg9[%c0_10, %c0_11], %19 {strides = array<i32>} : memref<32x1xf32, #tpu.memory_space<vmem>>, vector<32x1xf32>,
    %c0_12 = arith.constant 0 : index
    %c0_13 = arith.constant 0 : index
    %21 = vector.load %arg8[%c0_12, %c0_13] : memref<32x1xf32, #tpu.memory_space<vmem>>, vector<32x1xf32>
    tpu.vector_store %arg8[%c0_12, %c0_13], %9 {strides = array<i32>} : memref<32x1xf32, #tpu.memory_space<vmem>>, vector<32x1xf32>,
    %c0_i32_14 = arith.constant 0 : i32
    %22 = arith.cmpi eq, %arg1, %c0_i32_14 : i32
    %23 = arith.extui %22 : i1 to i32
    %c0_i32_15 = arith.constant 0 : i32
    %24 = arith.cmpi ne, %23, %c0_i32_15 : i32
    scf.if %24 {
      %c0_16 = arith.constant 0 : index
      %c0_17 = arith.constant 0 : index
      %25 = vector.load %arg7[%c0_16, %c0_17] : memref<32x1xf32, #tpu.memory_space<vmem>>, vector<32x1xf32>
      %c0_18 = arith.constant 0 : index
      %c0_19 = arith.constant 0 : index
      %26 = vector.load %arg8[%c0_18, %c0_19] : memref<32x1xf32, #tpu.memory_space<vmem>>, vector<32x1xf32>
      %27 = arith.maximumf %26, %25 : vector<32x1xf32>
      %28 = arith.subf %25, %27 : vector<32x1xf32>
      %29 = math.exp %28 : vector<32x1xf32>
      %30 = arith.subf %26, %27 : vector<32x1xf32>
      %31 = math.exp %30 : vector<32x1xf32>
      %c0_20 = arith.constant 0 : index
      %c0_21 = arith.constant 0 : index
      %32 = vector.load %arg9[%c0_20, %c0_21] : memref<32x1xf32, #tpu.memory_space<vmem>>, vector<32x1xf32>
      %33 = arith.mulf %31, %32 : vector<32x1xf32>
      %34 = arith.addf %29, %33 : vector<32x1xf32>
      %35 = math.log %34 : vector<32x1xf32>
      %36 = arith.addf %27, %35 : vector<32x1xf32>
      %37 = arith.subf %36, %25 : vector<32x1xf32>
      %c0_22 = arith.constant 0 : index
      %c0_23 = arith.constant 0 : index
      %38 = vector.load %arg5[%c0_22, %c0_23] : memref<32x1xf32, #tpu.memory_space<vmem>>, vector<32x1xf32>
      tpu.vector_store %arg5[%c0_22, %c0_23], %37 {strides = array<i32>} : memref<32x1xf32, #tpu.memory_space<vmem>>, vector<32x1xf32>,
    } else {
    }
    return
  }
  func.func @transform_0(%arg0: i32, %arg1: i32) -> (i32, i32) {
    %c0_i32 = arith.constant 0 : i32
    %c0_i32_0 = arith.constant 0 : i32
    return %arg0, %c0_i32 : i32, i32
  }
  func.func @transform_1(%arg0: i32, %arg1: i32) -> (i32, i32) {
    %c0_i32 = arith.constant 0 : i32
    %c0_i32_0 = arith.constant 0 : i32
    return %arg0, %c0_i32 : i32, i32
  }
  func.func @transform_2(%arg0: i32, %arg1: i32) -> (i32, i32) {
    %c0_i32 = arith.constant 0 : i32
    %c0_i32_0 = arith.constant 0 : i32
    return %arg1, %c0_i32 : i32, i32
  }
  func.func @transform_3(%arg0: i32, %arg1: i32) -> (i32, i32) {
    %c0_i32 = arith.constant 0 : i32
    %c0_i32_0 = arith.constant 0 : i32
    return %arg0, %c0_i32 : i32, i32
  }
}

</mosaic_0001>

<bundles_post_ra>
// kernel: tpu_custom_call.1
= control target key start
LH: loop header
LB: loop body
LE: loop exit
PB: predicated region body
PF: predicated region fallthrough
CT: control target
= control target key end

     0   :  { %8 = vsyncpa [#allocation7], 0  ;;  %s1222_s0 = inlined_call_operand.hbm [shape: f32[32,128], index: 0, kind: input, shape index: {}]   ;;  %s1223_s1 = inlined_call_operand.hbm [shape: f32[32,128], index: 1, kind: input, shape index: {}]   ;;  %s1224_s2 = inlined_call_operand.hbm [shape: bf16[512,128], index: 2, kind: input, shape index: {}]   ;;  %s1225_s3 = inlined_call_operand.vmem [shape: f32[32,1], index: 3, kind: output, shape index: {}]  }
   0x1   :  { %9 = vsyncpa [#allocation9], 0  ;;  %s945_s12 = smov [#allocation8]   ;;  %s946_s14 = smov [#allocation6]  }
   0x2   :  { %s27_s13 = sshll.u32 %s945_s12, 4  ;;  %s15_s15 = sshll.u32 %s946_s14, 4  ;;  %s28_s13 = int_to_ptr.vmem [resolvable:$true] %s27_s13  ;;  %s975_s15 = int_to_ptr.vmem [resolvable:$true] %s15_s15 }
   0x3   :  { %s875_s18 = scalar_lea.hbm %s1223_s1, 512 }
   0x4   :  { %p876_p0 = scmp.ne.s32.totalorder %s1223_s1, %s875_s18  ;;  %p879_p1 = scmp.lt.u32.totalorder %s875_s18, %s1223_s1 }
   0x6   :  { %p881_p2 = pnand %p879_p1, %p876_p0 }
   0x8   :  { %884 = shalt.err (!%p881_p2)
}
   0x9   :  { %s885_s23 = scalar_lea.vmem %s28_s13, 512  ;;  %p890_p4 = scmp.lt.s32.totalorder %s28_s13, %s28_s13 }
   0xa   :  { %p886_p3 = scmp.ne.s32.totalorder %s28_s13, %s885_s23  ;;  %p891_p5 = scmp.lt.s32.totalorder %s885_s23, %s885_s23 }
   0xc   :  { %p892_p6 = por %p891_p5, %p890_p4 }
   0xe   :  { %p893_p7 = pnand %p892_p6, %p886_p3 }
  0x10   :  { %896 = shalt.err (!%p893_p7)
}
  0x11   :  { %s947_s24 = smov 128   ;;  %s948_s25 = smov 8  }
  0x12   :  { %33 = dma.hbm_to_vmem [thread:$0]  %s1223_s1, 512, %s28_s13, [#allocation9], %s947_s24, %s947_s24, %s948_s25  }
  0x13   :  { %s897_s30 = scalar_lea.hbm %s1222_s0, 512 }
  0x14   :  { %p898_p8 = scmp.ne.s32.totalorder %s1222_s0, %s897_s30  ;;  %p901_p9 = scmp.lt.u32.totalorder %s897_s30, %s1222_s0 }
  0x16   :  { %p903_p10 = pnand %p901_p9, %p898_p8 }
  0x18   :  { %906 = shalt.err (!%p903_p10)
}
  0x19   :  { %s907_s8 = scalar_lea.vmem %s975_s15, 512  ;;  %p912_p12 = scmp.lt.s32.totalorder %s975_s15, %s975_s15 }
  0x1a   :  { %p908_p11 = scmp.ne.s32.totalorder %s975_s15, %s907_s8  ;;  %p913_p13 = scmp.lt.s32.totalorder %s907_s8, %s907_s8 }
  0x1c   :  { %p914_p0 = por %p913_p13, %p912_p12 }
  0x1e   :  { %p915_p1 = pnand %p914_p0, %p908_p11 }
  0x20   :  { %918 = shalt.err (!%p915_p1)
}
  0x21   :  { %21 = dma.hbm_to_vmem [thread:$0]  %s1222_s0, 512, %s975_s15, [#allocation7], %s947_s24, %s947_s24, %s948_s25  }
  0x22   :  { %s949_s10 = smov [#allocation10]   ;;  %s919_s14 = scalar_lea.hbm %s1224_s2, 4096 }
  0x23   :  { %s39_s11 = sshll.u32 %s949_s10, 4  ;;  %p920_p2 = scmp.ne.s32.totalorder %s1224_s2, %s919_s14  ;;  %s40_s11 = int_to_ptr.vmem [resolvable:$true] %s39_s11 }
  0x24   :  { %p923_p3 = scmp.lt.u32.totalorder %s919_s14, %s1224_s2 }
  0x26   :  { %p925_p4 = pnand %p923_p3, %p920_p2 }
  0x28   :  { %928 = shalt.err (!%p925_p4)
}
  0x29   :  { %s929_s20 = scalar_lea.vmem %s40_s11, 4096  ;;  %p934_p6 = scmp.lt.s32.totalorder %s40_s11, %s40_s11 }
  0x2a   :  { %p930_p5 = scmp.ne.s32.totalorder %s40_s11, %s929_s20  ;;  %p935_p7 = scmp.lt.s32.totalorder %s929_s20, %s929_s20 }
  0x2c   :  { %p936_p8 = por %p935_p7, %p934_p6 }
  0x2e   :  { %p937_p9 = pnand %p936_p8, %p930_p5 }
  0x30   :  { %940 = shalt.err (!%p937_p9)
}
  0x31   :  { %s950_s0 = smov 64   ;;  %s951_s15 = smov 4  }
  0x32   :  { %45 = dma.hbm_to_vmem [thread:$0]  %s1224_s2, 4096, %s40_s11, [#allocation9], %s950_s0, %s950_s0, %s951_s15  }
  0x33   :  { %941 = dma.done.wait [#allocation7], 512  }
  0x34   :  { %942 = vsyncadd [#allocation7], 4294966784 }
  0x35   :  { %943 = dma.done.wait [#allocation9], 4608  }
  0x36   :  { %944 = vsyncadd [#allocation9], 4294962688  ;;  %v779_v0 = vld [vmem:[#allocation10 + $0x40] sm:$0xff]   ;;  %v783_v4 = vld [vmem:[#allocation10 + $0x48] sm:$0xff]   ;;  %vm84_vm0 = vcmask 7168   ;;  %v952_v42 = vmov -inf  }
  0x37   :  { %v780_v1 = vld [vmem:[#allocation10 + $0xc0] sm:$0xff]   ;;  %727 = vmatprep.subr.bf16.mxu0 %v779_v0  ;;  %v784_v5 = vld [vmem:[#allocation10 + $0xc8] sm:$0xff]   ;;  %v787_v8 = vld [vmem:[#allocation10 + $0x50] sm:$0xff]   ;;  %101 = vst.msk [vmem:[#allocation4] sm:$0xff] %vm84_vm0, %v952_v42 }
  0x38   :  { %v781_v2 = vld [vmem:[#allocation10] sm:$0xff]   ;;  %747 = vmatprep.subr.bf16.mxu1 %v780_v1  ;;  %v785_v6 = vld [vmem:[#allocation10 + $0x8] sm:$0xff]   ;;  %v788_v9 = vld [vmem:[#allocation10 + $0xd0] sm:$0xff]   ;;  %102 = vst.msk [vmem:[#allocation4 + $0x8] sm:$0xff] %vm84_vm0, %v952_v42 }
  0x39   :  { %v782_v3 = vld [vmem:[#allocation10 + $0x80] sm:$0xff]   ;;  %728 = vmatpush3.bf16.xpose.msra.mxu0 %v781_v2  ;;  %v786_v7 = vld [vmem:[#allocation10 + $0x88] sm:$0xff]   ;;  %v789_v10 = vld [vmem:[#allocation10 + $0x10] sm:$0xff]   ;;  %103 = vst.msk [vmem:[#allocation4 + $0x10] sm:$0xff] %vm84_vm0, %v952_v42 }
  0x3a   :  { %748 = vmatpush3.bf16.xpose.msra.mxu1 %v782_v3  ;;  %729 = vmatprep.subr.bf16.mxu0 %v783_v4  ;;  %v790_v11 = vld [vmem:[#allocation10 + $0x90] sm:$0xff]   ;;  %v791_v12 = vld [vmem:[#allocation10 + $0x58] sm:$0xff]   ;;  %v795_v16 = vld [vmem:[#allocation10 + $0x60] sm:$0xff]   ;;  %104 = vst.msk [vmem:[#allocation4 + $0x18] sm:$0xff] %vm84_vm0, %v952_v42 }
  0x3b   :  { %749 = vmatprep.subr.bf16.mxu1 %v784_v5  ;;  %v792_v13 = vld [vmem:[#allocation10 + $0xd8] sm:$0xff]   ;;  %v796_v17 = vld [vmem:[#allocation10 + $0xe0] sm:$0xff]   ;;  %v1020_v20 = vld [vmem:[#allocation6 + $0x8] sm:$0xff] }
  0x3c   :  { %v793_v14 = vld [vmem:[#allocation10 + $0x18] sm:$0xff]   ;;  %v797_v18 = vld [vmem:[#allocation10 + $0x20] sm:$0xff]   ;;  %v799_v22 = vld [vmem:[#allocation10 + $0x68] sm:$0xff]   ;;  %v90_v24 = vmul.f32 14.285714, %v1020_v20 }
  0x3d   :  { %v794_v15 = vld [vmem:[#allocation10 + $0x98] sm:$0xff]   ;;  %v1018_v19 = vld [vmem:[#allocation6] sm:$0xff]  ;;  %v800_v25 = vld [vmem:[#allocation10 + $0xe8] sm:$0xff]  }
  0x3e   :  { %v798_v21 = vld [vmem:[#allocation10 + $0xa0] sm:$0xff]   ;;  %v89_v23 = vmul.f32 14.285714, %v1018_v19  ;;  %v801_v27 = vld [vmem:[#allocation10 + $0x28] sm:$0xff]   ;;  %v803_v29 = vld [vmem:[#allocation10 + $0x70] sm:$0xff]  }
  0x3f   :  { %v802_v28 = vld [vmem:[#allocation10 + $0xa8] sm:$0xff]   ;;  %v804_v30 = vld [vmem:[#allocation10 + $0xf0] sm:$0xff]   ;;  %v807_v33 = vld [vmem:[#allocation10 + $0x78] sm:$0xff]  }
  0x40   :  { %v93_v26 = vpack.c.bf16 %v90_v24, %v89_v23  ;;  %v805_v31 = vld [vmem:[#allocation10 + $0x30] sm:$0xff]   ;;  %v808_v34 = vld [vmem:[#allocation10 + $0xf8] sm:$0xff]  }
  0x41   :  { %730 = vmatpush3.bf16.xpose.msra.mxu0 %v785_v6  ;;  %v806_v32 = vld [vmem:[#allocation10 + $0xb0] sm:$0xff]   ;;  %v809_v35 = vld [vmem:[#allocation10 + $0x38] sm:$0xff]  }
  0x42   :  { %750 = vmatpush3.bf16.xpose.msra.mxu1 %v786_v7  ;;  %731 = vmatprep.subr.bf16.mxu0 %v787_v8  ;;  %v810_v36 = vld [vmem:[#allocation10 + $0xb8] sm:$0xff]   ;;  %v1024_v37 = vld [vmem:[#allocation6 + $0x10] sm:$0xff]  ;;  %v953_v7 = vmov 0   ;;  %v954_v8 = vmov 0.0  }
  0x43   :  { %751 = vmatprep.subr.bf16.mxu1 %v788_v9  ;;  %743 = vmatprep.mubr.bf16.mxu0 %v93_v26  ;;  %v1026_v38 = vld [vmem:[#allocation6 + $0x18] sm:$0xff]  ;;  %v91_v39 = vmul.f32 14.285714, %v1024_v37  ;;  %97 = vst.msk [vmem:[#allocation5] sm:$0xff] %vm84_vm0, %v954_v8  ;;  %98 = vst.msk [vmem:[#allocation5 + $0x8] sm:$0xff] %vm84_vm0, %v954_v8  ;;  %v1086_v9 = vld [vmem:[#allocation4] sm:$0xff] }
  0x44   :  { %763 = vmatprep.mubr.bf16.mxu1 %v93_v26  ;;  %v92_v40 = vmul.f32 14.285714, %v1026_v38  ;;  %777 = vset.pattern.permute.xlu0 %v953_v7  ;;  %99 = vst.msk [vmem:[#allocation5 + $0x10] sm:$0xff] %vm84_vm0, %v954_v8  ;;  %100 = vst.msk [vmem:[#allocation5 + $0x18] sm:$0xff] %vm84_vm0, %v954_v8 }
  0x45   :  { %778 = vset.pattern.permute.xlu1 %v953_v7 }
  0x46   :  { %v94_v41 = vpack.c.bf16 %v92_v40, %v91_v39 }
  0x49   :  { %732 = vmatpush3.bf16.xpose.msra.mxu0 %v789_v10 }
  0x4a   :  { %752 = vmatpush3.bf16.xpose.msra.mxu1 %v790_v11  ;;  %733 = vmatprep.subr.bf16.mxu0 %v791_v12  ;;  %v1091_v12 = vld [vmem:[#allocation4 + $0x8] sm:$0xff] }
  0x4b   :  { %753 = vmatprep.subr.bf16.mxu1 %v792_v13 }
  0x51   :  { %734 = vmatpush3.bf16.xpose.msra.mxu0 %v793_v14 }
  0x52   :  { %754 = vmatpush3.bf16.xpose.msra.mxu1 %v794_v15  ;;  %735 = vmatprep.subr.bf16.mxu0 %v795_v16  ;;  %v1101_v16 = vld [vmem:[#allocation4 + $0x10] sm:$0xff] }
  0x53   :  { %755 = vmatprep.subr.bf16.mxu1 %v796_v17 }
  0x59   :  { %736 = vmatpush3.bf16.xpose.msra.mxu0 %v797_v18 }
  0x5a   :  { %756 = vmatpush3.bf16.xpose.msra.mxu1 %v798_v21  ;;  %737 = vmatprep.subr.bf16.mxu0 %v799_v22  ;;  %v1111_v22 = vld [vmem:[#allocation4 + $0x18] sm:$0xff] }
  0x5b   :  { %757 = vmatprep.subr.bf16.mxu1 %v800_v25 }
  0x61   :  { %738 = vmatpush3.bf16.xpose.msra.mxu0 %v801_v27  ;;  %v65_v27 = vld [vmem:[#allocation8 + $0x8] sm:$0xff] }
  0x62   :  { %758 = vmatpush3.bf16.xpose.msra.mxu1 %v802_v28  ;;  %739 = vmatprep.subr.bf16.mxu0 %v803_v29  ;;  %v69_v28 = vmul.f32 %v65_v27, %v1020_v20  ;;  %v64_v29 = vld [vmem:[#allocation8] sm:$0xff] }
  0x63   :  { %759 = vmatprep.subr.bf16.mxu1 %v804_v30  ;;  %v68_v30 = vmul.f32 %v64_v29, %v1018_v19 }
  0x69   :  { %740 = vmatpush3.bf16.xpose.msra.mxu0 %v805_v31  ;;  %v66_v31 = vld [vmem:[#allocation8 + $0x10] sm:$0xff] }
  0x6a   :  { %760 = vmatpush3.bf16.xpose.msra.mxu1 %v806_v32  ;;  %741 = vmatprep.subr.bf16.mxu0 %v807_v33  ;;  %v70_v32 = vmul.f32 %v66_v31, %v1024_v37  ;;  %v67_v33 = vld [vmem:[#allocation8 + $0x18] sm:$0xff] }
  0x6b   :  { %761 = vmatprep.subr.bf16.mxu1 %v808_v34  ;;  %v71_v34 = vmul.f32 %v67_v33, %v1026_v38 }
  0x71   :  { %742 = vmatpush3.bf16.xpose.msra.mxu0 %v809_v35 }
  0x72   :  { %762 = vmatpush3.bf16.xpose.msra.mxu1 %v810_v36 }
  0x78   :  { %744 = vmatmul.mubr.bf16.vlgmr.msra.gmra.mrb[0].mxu0 %v93_v26 }
  0x79   :  { %764 = vmatmul.mubr.bf16.vlgmr.msra.gmra.mrb[0].mxu1 %v93_v26  ;;  %745 = vmatprep.mubr.bf16.mxu0 %v94_v41 }
  0x7a   :  { %765 = vmatprep.mubr.bf16.mxu1 %v94_v41 }
  0x80   :  { %746 = vmatmul.mubr.bf16.gmra.mrb[4].mxu0 %v94_v41 }
  0x81   :  { %766 = vmatmul.mubr.bf16.gmra.mrb[4].mxu1 %v94_v41 }
 0x14b   :  { %v1034_v43 = vpop.f32.mrb[0].mxu0 }
 0x14c   :  { %v1036_v44 = vpop.f32.mrb[0].mxu1  ;;  %v1038_v45 = vpop.f32.mrb[1].mxu0 }
 0x14d   :  { %v473_v46 = vmax.f32 %v1034_v43, %v1038_v45  ;;  %v1042_v47 = vpop.f32.mrb[1].mxu1  ;;  %v1044_v48 = vpop.f32.mrb[2].mxu0 }
 0x14e   :  { %v1046_v49 = vpop.f32.mrb[2].mxu1  ;;  %v1048_v50 = vpop.f32.mrb[3].mxu0 }
 0x14f   :  { %v478_v51 = vmax.f32 %v1044_v48, %v1048_v50  ;;  %v1052_v52 = vpop.f32.mrb[3].mxu1  ;;  %v474_v53 = vmax.f32 %v473_v46, %v1036_v44 }
 0x151   :  { %v475_v54 = vmax.f32 %v474_v53, %v1042_v47  ;;  %v479_v55 = vmax.f32 %v478_v51, %v1046_v49 }
 0x153   :  { %476 = vmax.xlane.f32.xlu0 %v475_v54  ;;  %v1057_v56 = vpop.f32.mrb[4].mxu0  ;;  %v480_v57 = vmax.f32 %v479_v55, %v1052_v52 }
 0x154   :  { %v1060_v58 = vpop.f32.mrb[4].mxu1  ;;  %v1062_v59 = vpop.f32.mrb[5].mxu0 }
 0x155   :  { %v483_v60 = vmax.f32 %v1057_v56, %v1062_v59  ;;  %v1066_v61 = vpop.f32.mrb[5].mxu1  ;;  %v1068_v62 = vpop.f32.mrb[6].mxu0 }
 0x156   :  { %v1070_v63 = vpop.f32.mrb[6].mxu1  ;;  %v1072_v0 = vpop.f32.mrb[7].mxu0 }
 0x157   :  { %v488_v1 = vmax.f32 %v1068_v62, %v1072_v0  ;;  %v1076_v2 = vpop.f32.mrb[7].mxu1  ;;  %481 = vmax.xlane.f32.xlu0 %v480_v57  ;;  %v484_v3 = vmax.f32 %v483_v60, %v1060_v58 }
 0x159   :  { %v489_v4 = vmax.f32 %v488_v1, %v1070_v63  ;;  %v485_v5 = vmax.f32 %v484_v3, %v1066_v61 }
 0x15b   :  { %v490_v6 = vmax.f32 %v489_v4, %v1076_v2  ;;  %486 = vmax.xlane.f32.xlu1 %v485_v5 }
 0x15f   :  { %491 = vmax.xlane.f32.xlu1 %v490_v6 }
 0x1e0   :  { %v477_v10 = vpop.xlane.xlu0 %476 }
 0x1e1   :  { %v1089_v11 = vmax.f32 %v1086_v9, %v477_v10 }
 0x1e3   :  { %v497_v13 = vsub.f32 %v1086_v9, %v1089_v11  ;;  %614 = vst.msk [vmem:[#allocation4] sm:$0xff] %vm84_vm0, %v1089_v11  ;;  %519 = vperm.xlu0 %777, %v1089_v11  }
 0x1e4   :  { %v482_v14 = vpop.xlane.xlu0 %481 }
 0x1e5   :  { %v1099_v15 = vmax.f32 %v1091_v12, %v482_v14 }
 0x1e7   :  { %v498_v17 = vsub.f32 %v1091_v12, %v1099_v15  ;;  %615 = vst.msk [vmem:[#allocation4 + $0x8] sm:$0xff] %vm84_vm0, %v1099_v15  ;;  %524 = vperm.xlu1 %778, %v1099_v15  }
 0x1e8   :  { %v487_v18 = vpop.xlane.xlu1 %486 }
 0x1e9   :  { %v1109_v21 = vmax.f32 %v1101_v16, %v487_v18 }
 0x1eb   :  { %v499_v23 = vsub.f32 %v1101_v16, %v1109_v21  ;;  %616 = vst.msk [vmem:[#allocation4 + $0x10] sm:$0xff] %vm84_vm0, %v1109_v21  ;;  %529 = vperm.xlu1 %778, %v1109_v21  }
 0x1ec   :  { %v492_v24 = vpop.xlane.xlu1 %491 }
 0x1ed   :  { %v1119_v25 = vmax.f32 %v1111_v22, %v492_v24 }
 0x1ee   :  { %v626_v9 = vld [vmem:[#allocation4 + $0x8] sm:$0xff] }
 0x1ef   :  { %v500_v26 = vsub.f32 %v1111_v22, %v1119_v25  ;;  %617 = vst.msk [vmem:[#allocation4 + $0x18] sm:$0xff] %vm84_vm0, %v1119_v25  ;;  %534 = vperm.xlu1 %778, %v1119_v25  }
 0x1f1   :  { %v507_v12 = vmul.f32 1.442695, %v500_v26 }
 0x1f6   :  { %v628_v25 = vld [vmem:[#allocation4 + $0x18] sm:$0xff] }
 0x202   :  { %74 = vadd.xlane.f32.xlu0 %v69_v28 }
 0x213   :  { %72 = vadd.xlane.f32.xlu1 %v68_v30 }
 0x217   :  { %76 = vadd.xlane.f32.xlu1 %v70_v32 }
 0x21b   :  { %78 = vadd.xlane.f32.xlu1 %v71_v34 }
 0x262   :  { %v520_v35 = vpop.permute.xlu0 %519 }
 0x263   :  { %v537_v36 = vsub.f32 %v1034_v43, %v520_v35  ;;  %v538_v39 = vsub.f32 %v1038_v45, %v520_v35  ;;  %v539_v20 = vsub.f32 %v1036_v44, %v520_v35  ;;  %v540_v40 = vsub.f32 %v1042_v47, %v520_v35 }
 0x265   :  { %v553_v41 = vmul.f32 1.442695, %v537_v36  ;;  %v555_v19 = vmul.f32 1.442695, %v538_v39  ;;  %v557_v42 = vmul.f32 1.442695, %v539_v20 }
 0x266   :  { %v559_v46 = vmul.f32 1.442695, %v540_v40  ;;  %v525_v51 = vpop.permute.xlu1 %524 }
 0x267   :  { %811 = vpow2.f32 %v553_v41  ;;  %v541_v37 = vsub.f32 %v1044_v48, %v525_v51  ;;  %v542_v38 = vsub.f32 %v1048_v50, %v525_v51  ;;  %v543_v53 = vsub.f32 %v1046_v49, %v525_v51 }
 0x268   :  { %813 = vpow2.f32 %v555_v19  ;;  %v544_v43 = vsub.f32 %v1052_v52, %v525_v51 }
 0x269   :  { %815 = vpow2.f32 %v557_v42  ;;  %v561_v45 = vmul.f32 1.442695, %v541_v37  ;;  %v563_v44 = vmul.f32 1.442695, %v542_v38  ;;  %v565_v54 = vmul.f32 1.442695, %v543_v53 }
 0x26a   :  { %817 = vpow2.f32 %v559_v46  ;;  %v567_v47 = vmul.f32 1.442695, %v544_v43  ;;  %v530_v55 = vpop.permute.xlu1 %529 }
 0x26b   :  { %819 = vpow2.f32 %v561_v45  ;;  %v545_v57 = vsub.f32 %v1057_v56, %v530_v55  ;;  %v546_v60 = vsub.f32 %v1062_v59, %v530_v55  ;;  %v547_v48 = vsub.f32 %v1060_v58, %v530_v55 }
 0x26c   :  { %821 = vpow2.f32 %v563_v44  ;;  %v548_v49 = vsub.f32 %v1066_v61, %v530_v55 }
 0x26d   :  { %823 = vpow2.f32 %v565_v54  ;;  %v569_v50 = vmul.f32 1.442695, %v545_v57  ;;  %v571_v52 = vmul.f32 1.442695, %v546_v60  ;;  %v573_v1 = vmul.f32 1.442695, %v547_v48 }
 0x26e   :  { %825 = vpow2.f32 %v567_v47  ;;  %v575_v3 = vmul.f32 1.442695, %v548_v49  ;;  %v535_v4 = vpop.permute.xlu1 %534  ;;  %v501_v60 = vmul.f32 1.442695, %v497_v13  ;;  %v503_v49 = vmul.f32 1.442695, %v498_v17 }
 0x26f   :  { %827 = vpow2.f32 %v569_v50  ;;  %v549_v5 = vsub.f32 %v1068_v62, %v535_v4  ;;  %v550_v6 = vsub.f32 %v1072_v0, %v535_v4  ;;  %v551_v56 = vsub.f32 %v1070_v63, %v535_v4  ;;  %v625_v50 = vld [vmem:[#allocation4] sm:$0xff]  ;;  %v627_v17 = vld [vmem:[#allocation4 + $0x10] sm:$0xff] }
 0x270   :  { %829 = vpow2.f32 %v571_v52  ;;  %v552_v58 = vsub.f32 %v1076_v2, %v535_v4 }
 0x271   :  { %v812_v59 = vpop.eup %811  ;;  %831 = vpow2.f32 %v573_v1  ;;  %v577_v61 = vmul.f32 1.442695, %v549_v5  ;;  %v579_v7 = vmul.f32 1.442695, %v550_v6  ;;  %v581_v10 = vmul.f32 1.442695, %v551_v56 }
 0x272   :  { %v814_v8 = vpop.eup %813  ;;  %833 = vpow2.f32 %v575_v3  ;;  %v583_v62 = vmul.f32 1.442695, %v552_v58  ;;  %v505_v3 = vmul.f32 1.442695, %v499_v23  ;;  %v509_v6 = vld [vmem:[#allocation5] sm:$0xff] }
 0x273   :  { %v816_v14 = vpop.eup %815  ;;  %835 = vpow2.f32 %v577_v61  ;;  %v585_v18 = vadd.f32 %v814_v8, %v812_v59 }
 0x274   :  { %v818_v24 = vpop.eup %817  ;;  %837 = vpow2.f32 %v579_v7 }
 0x275   :  { %v820_v27 = vpop.eup %819  ;;  %v586_v0 = vadd.f32 %v816_v14, %v585_v18  ;;  %839 = vpow2.f32 %v581_v10  ;;  %v510_v14 = vld [vmem:[#allocation5 + $0x8] sm:$0xff] }
 0x276   :  { %v822_v28 = vpop.eup %821  ;;  %841 = vpow2.f32 %v583_v62 }
 0x277   :  { %v824_v63 = vpop.eup %823  ;;  %v587_v29 = vadd.f32 %v818_v24, %v586_v0  ;;  %v590_v2 = vadd.f32 %v822_v28, %v820_v27  ;;  %843 = vpow2.f32 %v501_v60 }
 0x278   :  { %v826_v30 = vpop.eup %825  ;;  %845 = vpow2.f32 %v503_v49 }
 0x279   :  { %v828_v31 = vpop.eup %827  ;;  %588 = vadd.xlane.f32.xlu1 %v587_v29  ;;  %v591_v32 = vadd.f32 %v824_v63, %v590_v2  ;;  %847 = vpow2.f32 %v505_v3  ;;  %v511_v2 = vld [vmem:[#allocation5 + $0x10] sm:$0xff] }
 0x27a   :  { %v830_v33 = vpop.eup %829  ;;  %849 = vpow2.f32 %v507_v12 }
 0x27b   :  { %v832_v34 = vpop.eup %831  ;;  %v592_v35 = vadd.f32 %v826_v30, %v591_v32  ;;  %v595_v36 = vadd.f32 %v830_v33, %v828_v31 }
 0x27c   :  { %v834_v39 = vpop.eup %833 }
 0x27d   :  { %v836_v20 = vpop.eup %835  ;;  %593 = vadd.xlane.f32.xlu1 %v592_v35  ;;  %v596_v40 = vadd.f32 %v832_v34, %v595_v36 }
 0x27e   :  { %v838_v41 = vpop.eup %837 }
 0x27f   :  { %v597_v19 = vadd.f32 %v834_v39, %v596_v40  ;;  %v600_v42 = vadd.f32 %v838_v41, %v836_v20  ;;  %v840_v46 = vpop.eup %839  ;;  %v512_v39 = vld [vmem:[#allocation5 + $0x18] sm:$0xff] }
 0x280   :  { %v842_v37 = vpop.eup %841 }
 0x281   :  { %598 = vadd.xlane.f32.xlu0 %v597_v19  ;;  %v601_v51 = vadd.f32 %v840_v46, %v600_v42  ;;  %v844_v5 = vpop.eup %843 }
 0x282   :  { %v513_v26 = vmul.f32 %v844_v5, %v509_v6  ;;  %v846_v59 = vpop.eup %845 }
 0x283   :  { %v602_v38 = vadd.f32 %v842_v37, %v601_v51  ;;  %v514_v27 = vmul.f32 %v846_v59, %v510_v14  ;;  %v848_v0 = vpop.eup %847 }
 0x284   :  { %v515_v33 = vmul.f32 %v848_v0, %v511_v2  ;;  %v850_v34 = vpop.eup %849 }
 0x285   :  { %603 = vadd.xlane.f32.xlu1 %v602_v38  ;;  %v516_v46 = vmul.f32 %v850_v34, %v512_v39 }
 0x28f   :  { %v75_v53 = vpop.xlane.xlu0 %74 }
 0x290   :  { %v81_v43 = vmul.f32 14.285714, %v75_v53 }
 0x292   :  { %86 = vst.msk [vmem:[#allocation3 + $0x8] sm:$0xff] %vm84_vm0, %v81_v43 }
 0x299   :  { %v1161_v1 = vld [vmem:[#allocation3 + $0x8] sm:$0xff] }
 0x29a   :  { %v1167_v11 = vmax.f32 %v626_v9, %v1161_v1 }
 0x29c   :  { %v646_v16 = vsub.f32 %v626_v9, %v1167_v11  ;;  %v634_v58 = vsub.f32 %v1161_v1, %v1167_v11 }
 0x29e   :  { %v651_v61 = vmul.f32 1.442695, %v646_v16  ;;  %v639_v24 = vmul.f32 1.442695, %v634_v58 }
 0x2a0   :  { %v73_v45 = vpop.xlane.xlu1 %72 }
 0x2a1   :  { %v80_v44 = vmul.f32 14.285714, %v73_v45 }
 0x2a3   :  { %85 = vst.msk [vmem:[#allocation3] sm:$0xff] %vm84_vm0, %v80_v44 }
 0x2a4   :  { %v77_v54 = vpop.xlane.xlu1 %76 }
 0x2a5   :  { %v82_v47 = vmul.f32 14.285714, %v77_v54 }
 0x2a7   :  { %87 = vst.msk [vmem:[#allocation3 + $0x10] sm:$0xff] %vm84_vm0, %v82_v47 }
 0x2a8   :  { %v79_v55 = vpop.xlane.xlu1 %78 }
 0x2a9   :  { %v83_v57 = vmul.f32 14.285714, %v79_v55 }
 0x2aa   :  { %v1153_v48 = vld [vmem:[#allocation3] sm:$0xff] }
 0x2ab   :  { %88 = vst.msk [vmem:[#allocation3 + $0x18] sm:$0xff] %vm84_vm0, %v83_v57  ;;  %v1159_v52 = vmax.f32 %v625_v50, %v1153_v48 }
 0x2ad   :  { %v645_v13 = vsub.f32 %v625_v50, %v1159_v52  ;;  %v633_v15 = vsub.f32 %v1153_v48, %v1159_v52 }
 0x2ae   :  { %v1170_v4 = vld [vmem:[#allocation3 + $0x10] sm:$0xff] }
 0x2af   :  { %v649_v21 = vmul.f32 1.442695, %v645_v13  ;;  %v1179_v23 = vmax.f32 %v627_v17, %v1170_v4  ;;  %v637_v22 = vmul.f32 1.442695, %v633_v15 }
 0x2b1   :  { %851 = vpow2.f32 %v649_v21  ;;  %v647_v7 = vsub.f32 %v627_v17, %v1179_v23  ;;  %v635_v62 = vsub.f32 %v1170_v4, %v1179_v23 }
 0x2b2   :  { %v1181_v56 = vld [vmem:[#allocation3 + $0x18] sm:$0xff]  ;;  %853 = vpow2.f32 %v637_v22 }
 0x2b3   :  { %v1187_v8 = vmax.f32 %v628_v25, %v1181_v56  ;;  %855 = vpow2.f32 %v651_v61  ;;  %v653_v28 = vmul.f32 1.442695, %v647_v7  ;;  %v641_v31 = vmul.f32 1.442695, %v635_v62 }
 0x2b4   :  { %857 = vpow2.f32 %v639_v24 }
 0x2b5   :  { %v648_v63 = vsub.f32 %v628_v25, %v1187_v8  ;;  %v636_v32 = vsub.f32 %v1181_v56, %v1187_v8  ;;  %859 = vpow2.f32 %v653_v28 }
 0x2b6   :  { %861 = vpow2.f32 %v641_v31 }
 0x2b7   :  { %v655_v35 = vmul.f32 1.442695, %v648_v63  ;;  %v643_v41 = vmul.f32 1.442695, %v636_v32 }
 0x2b9   :  { %863 = vpow2.f32 %v655_v35 }
 0x2ba   :  { %865 = vpow2.f32 %v643_v41 }
 0x2bb   :  { %v852_v40 = vpop.eup %851 }
 0x2bc   :  { %v854_v51 = vpop.eup %853 }
 0x2bd   :  { %v856_v43 = vpop.eup %855 }
 0x2be   :  { %v858_v54 = vpop.eup %857 }
 0x2bf   :  { %v860_v55 = vpop.eup %859 }
 0x2c0   :  { %v862_v49 = vpop.eup %861 }
 0x2c3   :  { %v864_v3 = vpop.eup %863 }
 0x2c4   :  { %v866_v12 = vpop.eup %865 }
 0x306   :  { %v589_v10 = vpop.xlane.xlu1 %588 }
 0x307   :  { %v605_v18 = vadd.f32 %v589_v10, %v513_v26 }
 0x309   :  { %610 = vst.msk [vmem:[#allocation5] sm:$0xff] %vm84_vm0, %v605_v18 }
 0x30a   :  { %v594_v29 = vpop.xlane.xlu1 %593 }
 0x30b   :  { %v606_v30 = vadd.f32 %v594_v29, %v514_v27 }
 0x30d   :  { %611 = vst.msk [vmem:[#allocation5 + $0x8] sm:$0xff] %vm84_vm0, %v606_v30 }
 0x30e   :  { %v599_v36 = vpop.xlane.xlu0 %598 }
 0x30f   :  { %v607_v20 = vadd.f32 %v599_v36, %v515_v33 }
 0x310   :  { %v657_v19 = vld [vmem:[#allocation5] sm:$0xff] }
 0x311   :  { %v661_v42 = vmul.f32 %v852_v40, %v657_v19  ;;  %612 = vst.msk [vmem:[#allocation5 + $0x10] sm:$0xff] %vm84_vm0, %v607_v20 }
 0x312   :  { %v604_v37 = vpop.xlane.xlu1 %603 }
 0x313   :  { %v665_v38 = vadd.f32 %v854_v51, %v661_v42  ;;  %v608_v53 = vadd.f32 %v604_v37, %v516_v46 }
 0x314   :  { %v658_v45 = vld [vmem:[#allocation5 + $0x8] sm:$0xff] }
 0x315   :  { %867 = vlog2.f32 %v665_v38  ;;  %v662_v44 = vmul.f32 %v856_v43, %v658_v45  ;;  %613 = vst.msk [vmem:[#allocation5 + $0x18] sm:$0xff] %vm84_vm0, %v608_v53 }
 0x317   :  { %v666_v47 = vadd.f32 %v858_v54, %v662_v44 }
 0x318   :  { %v659_v57 = vld [vmem:[#allocation5 + $0x10] sm:$0xff] }
 0x319   :  { %869 = vlog2.f32 %v666_v47  ;;  %v663_v60 = vmul.f32 %v860_v55, %v659_v57 }
 0x31b   :  { %v667_v50 = vadd.f32 %v862_v49, %v663_v60 }
 0x31c   :  { %v660_v9 = vld [vmem:[#allocation5 + $0x18] sm:$0xff] }
 0x31d   :  { %871 = vlog2.f32 %v667_v50  ;;  %v664_v13 = vmul.f32 %v864_v3, %v660_v9 }
 0x31f   :  { %v868_v15 = vpop.eup %867  ;;  %v668_v17 = vadd.f32 %v866_v12, %v664_v13 }
 0x320   :  { %v670_v5 = vmul.f32 0.6931472, %v868_v15 }
 0x321   :  { %873 = vlog2.f32 %v668_v17 }
 0x322   :  { %v677_v16 = vadd.f32 %v670_v5, %v1159_v52 }
 0x323   :  { %v870_v21 = vpop.eup %869 }
 0x324   :  { %v681_v6 = vsub.f32 %v677_v16, %v1153_v48  ;;  %v672_v58 = vmul.f32 0.6931472, %v870_v21 }
 0x326   :  { %685 = vst.msk [vmem:[%s1225_s3] sm:$0xff] %vm84_vm0, %v681_v6  ;;  %v678_v22 = vadd.f32 %v672_v58, %v1167_v11 }
 0x327   :  { %v872_v25 = vpop.eup %871 }
 0x328   :  { %v682_v26 = vsub.f32 %v678_v22, %v1161_v1  ;;  %v674_v59 = vmul.f32 0.6931472, %v872_v25 }
 0x32a   :  { %686 = vst.msk [vmem:[%s1225_s3 + $0x8] sm:$0xff] %vm84_vm0, %v682_v26  ;;  %v679_v52 = vadd.f32 %v674_v59, %v1179_v23 }
 0x32b   :  { %v874_v48 = vpop.eup %873 }
 0x32c   :  { %v683_v61 = vsub.f32 %v679_v52, %v1170_v4  ;;  %v676_v7 = vmul.f32 0.6931472, %v874_v48 }
 0x32e   :  { %687 = vst.msk [vmem:[%s1225_s3 + $0x10] sm:$0xff] %vm84_vm0, %v683_v61  ;;  %v680_v11 = vadd.f32 %v676_v7, %v1187_v8 }
 0x330   :  { %v684_v1 = vsub.f32 %v680_v11, %v1181_v56 }
 0x332   :  { %688 = vst.msk [vmem:[%s1225_s3 + $0x18] sm:$0xff] %vm84_vm0, %v684_v1 }
 0x333   :  { %693 = vsyncpa [#allocation7], 1 }
 0x334   :  { %694 = vsyncpa [#allocation9], 1 }

</bundles_post_ra>
